<compile_context>
chip_gen: v6e
topology: v6e:2x2x1
jax: 0.10.0
libtpu: 0.0.40
codegen_flags: <defaults>
</compile_context>

<pallas_src>
import functools

import jax
import jax.numpy as jnp
from jax.experimental import pallas as pl
from jax.experimental.pallas import tpu as pltpu


def _cdiv(a, b):
    return -(-a // b)


def _vmem_budget_bytes():
    """(working-set budget for blocks+temporaries, explicit scoped-VMEM limit)."""
    cap = 64 * 1024 * 1024  # conservative fallback == smallest per-core VMEM (v7x)
    try:
        info = pltpu.get_tpu_info()
        cap = int(getattr(info, "vmem_capacity_bytes", cap))
    except Exception:
        pass
    budget = min(int(cap * 0.40), 48 * 1024 * 1024)   # v5e/v6e ~48 MiB, v7x ~25 MiB
    limit = min(int(cap * 0.75), 100 * 1024 * 1024)   # raise above the 16/32 MiB scoped defaults
    limit = max(limit, budget + (8 << 20))
    return budget, limit


def _choose_tiling(n, c, hw, in_itemsize, budget_bytes):
    """Pick (num_partitions P, spatial steps per partition n_s, tile size TS, padded HW).

    VMEM model per spatial tile:
        2 x (input block + target block)        (double buffering)
      + 4 x (N*C*TS) f32                        (bool / f32 temporaries inside the kernel)
    TS is always a multiple of 128 so vregs are lane-dense.
    """
    lane = 128
    per_chunk = lane * (n * c * (2 * in_itemsize + 4 * 4) + 2 * n * 4)
    max_chunks = max(1, budget_bytes // per_chunk)

    hw_chunks = _cdiv(hw, lane)
    num_parts = 2 if hw_chunks >= 2 else 1            # keep both v7x TensorCores busy
    chunks_per_part = _cdiv(hw_chunks, num_parts)
    n_s = _cdiv(chunks_per_part, max_chunks)
    chunks_per_tile = _cdiv(chunks_per_part, n_s)
    ts = chunks_per_tile * lane
    return num_parts, n_s, ts, num_parts * n_s * ts


def _tversky_sums_kernel(x_ref, t_ref, out_ref, sp_ref, st_ref, pg_ref, *, num_classes):
    s = pl.program_id(1)                               # spatial step (reduction axis, last)

    @pl.when(s == 0)
    def _():
        sp_ref[...] = jnp.zeros_like(sp_ref)
        st_ref[...] = jnp.zeros_like(st_ref)
        pg_ref[...] = jnp.zeros_like(pg_ref)

    x = x_ref[...]                                     # (N, C, TS) native dtype
    t = t_ref[...]                                     # (N, TS) int32

    # pred = argmax over cat(1-p, p)  ==  (p > 0.5); compare in native dtype (no slab upcast).
    pred = x > jnp.asarray(0.5, dtype=x.dtype)         # bool (N, C, TS)
    cls = jax.lax.broadcasted_iota(jnp.int32, (1, num_classes, 1), 1)
    tgt = t[:, None, :] == cls                         # bool (N, C, TS): per-class one-hot
    pg = jnp.logical_and(pred, tgt)                    # bool (N, C, TS)

    # Per-(batch, class) partial sums for this tile; cast to f32 only at the reduction.
    sp_ref[...] += jnp.sum(pred.astype(jnp.float32), axis=-1)   # sum(pred)
    st_ref[...] += jnp.sum(tgt.astype(jnp.float32), axis=-1)    # sum(tgt)
    pg_ref[...] += jnp.sum(pg.astype(jnp.float32), axis=-1)     # sum(pred*tgt) = P_G

    @pl.when(s == pl.num_programs(1) - 1)
    def _():
        out_ref[0] = sp_ref[...]
        out_ref[1] = st_ref[...]
        out_ref[2] = pg_ref[...]


def focal_binary_tversky_loss(inputs, targets, *, alpha=0.5, beta=0.7, gamma=1.0):
    """inputs: (N, C, H, W) float probabilities; targets: (N, H, W) int class labels."""
    # FocalBinaryTverskyFunc.__init__ renormalizes alpha/beta if they don't sum to 1.
    sab = alpha + beta
    if sab != 1:
        alpha, beta = alpha / sab, beta / sab
    eps = 1e-6

    N, C, H, W = inputs.shape
    HW = H * W

    x = inputs.reshape(N, C, HW)                       # free reshape on contiguous NCHW
    t = targets.reshape(N, HW)
    if t.dtype != jnp.int32:
        t = t.astype(jnp.int32)                        # read once; exact for any label range

    budget, vmem_limit = _vmem_budget_bytes()
    P, n_s, ts, hw_pad = _choose_tiling(N, C, HW, inputs.dtype.itemsize, budget)

    if hw_pad != HW:
        # prob pad 0.0 -> pred False; target pad -1 -> matches no class: sums unaffected.
        x = jnp.pad(x, ((0, 0), (0, 0), (0, hw_pad - HW)))
        t = jnp.pad(t, ((0, 0), (0, hw_pad - HW)), constant_values=-1)

    kernel = functools.partial(_tversky_sums_kernel, num_classes=C)

    raw = pl.pallas_call(
        kernel,
        # Per partition: rows [sum(pred), sum(tgt), sum(pred*tgt)], each (N, C).
        out_shape=jax.ShapeDtypeStruct((P * 3, N, C), jnp.float32),
        grid_spec=pltpu.PrefetchScalarGridSpec(
            num_scalar_prefetch=0,
            grid=(P, n_s),                             # partitions (parallel), spatial (reduction)
            in_specs=[
                pl.BlockSpec((N, C, ts), lambda p, s: (0, 0, p * n_s + s)),
                pl.BlockSpec((N, ts), lambda p, s: (0, p * n_s + s)),
            ],
            out_specs=pl.BlockSpec((3, N, C), lambda p, s: (p, 0, 0)),
            scratch_shapes=[
                pltpu.VMEM((N, C), jnp.float32),       # sum(pred)
                pltpu.VMEM((N, C), jnp.float32),       # sum(tgt)
                pltpu.VMEM((N, C), jnp.float32),       # sum(pred*tgt)
            ],
        ),
        compiler_params=pltpu.CompilerParams(
            dimension_semantics=("parallel", "arbitrary"),
            vmem_limit_bytes=vmem_limit,
        ),
    )(x, t)

    sums = jnp.sum(raw.reshape(P, 3, N, C), axis=0)    # combine spatial partitions
    sum_pred, sum_tgt, sum_pg = sums[0], sums[1], sums[2]

    # alpha + beta == 1  =>  P_G + a*P_NG + b*NP_G == a*sum(pred) + b*sum(tgt)
    denom = alpha * sum_pred + beta * sum_tgt + eps
    index = sum_pg / denom                             # (N, C)
    if gamma == 1.0:
        loss = 1.0 - index
    else:
        loss = jnp.power(1.0 - index, 1.0 / gamma)
    per_class = jnp.mean(loss, axis=0)                 # reduction='mean' over batch -> (C,)
    # MultiTverskyLoss default per-class weight = 1/C.
    return jnp.sum(per_class) * (1.0 / C)


def _reference(inputs, targets, *, alpha=0.5, beta=0.7, gamma=1.0):
    sab = alpha + beta
    if sab != 1:
        alpha, beta = alpha / sab, beta / sab
    N, C, H, W = inputs.shape
    total = 0.0
    for c in range(C):
        p = inputs[:, c].reshape(N, -1).astype(jnp.float32)
        pred = (p > 0.5).astype(jnp.float32)
        tgt = (targets.reshape(N, -1) == c).astype(jnp.float32)
        pg = jnp.sum(pred * tgt, axis=1)
        png = jnp.sum(pred * (1.0 - tgt), axis=1)
        npg = jnp.sum((1.0 - pred) * tgt, axis=1)
        index = pg / (pg + alpha * png + beta * npg + 1e-6)
        loss = jnp.power(1.0 - index, 1.0 / gamma)
        total = total + jnp.mean(loss) * (1.0 / C)
    return total


if __name__ == "__main__":
    key = jax.random.PRNGKey(0)
    k1, k2, k3, k4 = jax.random.split(key, 4)

    # Test 1: lane-aligned spatial size (16*16 = 2*128), even C -> 2 parallel partitions.
    N, C, H, W = 2, 4, 16, 16
    inputs = jax.random.uniform(k1, (N, C, H, W), dtype=jnp.float32)       # probabilities
    targets = jax.random.randint(k2, (N, H, W), 0, C, dtype=jnp.int32)     # class labels
    loss = jax.block_until_ready(
        focal_binary_tversky_loss(inputs, targets, alpha=0.5, beta=0.7, gamma=1.0))
    ref = _reference(inputs, targets, alpha=0.5, beta=0.7, gamma=1.0)
    assert jnp.allclose(loss, ref, atol=1e-5, rtol=1e-5), (loss, ref)

    # Test 2: non-multiple-of-128 spatial size (exercises padding), odd C, gamma != 1.
    N2, C2, H2, W2 = 3, 3, 10, 10
    inputs2 = jax.random.uniform(k3, (N2, C2, H2, W2), dtype=jnp.float32)
    targets2 = jax.random.randint(k4, (N2, H2, W2), 0, C2, dtype=jnp.int32)
    loss2 = jax.block_until_ready(
        focal_binary_tversky_loss(inputs2, targets2, alpha=0.3, beta=0.7, gamma=2.0))
    ref2 = _reference(inputs2, targets2, alpha=0.3, beta=0.7, gamma=2.0)
    assert jnp.allclose(loss2, ref2, atol=1e-5, rtol=1e-5), (loss2, ref2)

    print("KERNEL_OK")
</pallas_src>

<mosaic_0001>
module attributes {stable_mosaic.version = 11 : i64} {
  func.func @_tversky_sums_kernel(%arg0: i32, %arg1: i32, %arg2: memref<2x4x128xf32, #tpu.memory_space<vmem>>, %arg3: memref<2x128xi32, #tpu.memory_space<vmem>>, %arg4: memref<3x2x4xf32, #tpu.memory_space<vmem>>, %arg5: memref<2x4xf32, #tpu.memory_space<vmem>>, %arg6: memref<2x4xf32, #tpu.memory_space<vmem>>, %arg7: memref<2x4xf32, #tpu.memory_space<vmem>>) attributes {dimension_semantics = [#tpu.dimension_semantics<parallel>, #tpu.dimension_semantics<arbitrary>], iteration_bounds = array<i64: 2, 1>, scalar_prefetch = 0 : i64, scratch_operands = 3 : i64, tpu.core_type = #tpu.core_type<tc>, window_params = [{transform_indices = @transform_0, window_bounds = array<i64: 2, 4, 128>}, {transform_indices = @transform_1, window_bounds = array<i64: 2, 128>}, {transform_indices = @transform_2, window_bounds = array<i64: 3, 2, 4>}]} {
    %c0_i32 = arith.constant 0 : i32
    %0 = arith.cmpi eq, %arg1, %c0_i32 : i32
    %1 = arith.extui %0 : i1 to i32
    %c0_i32_0 = arith.constant 0 : i32
    %2 = arith.cmpi ne, %1, %c0_i32_0 : i32
    scf.if %2 {
      %cst_22 = arith.constant 0.000000e+00 : f32
      %34 = vector.broadcast %cst_22 : f32 to vector<2x4xf32>
      %c0_23 = arith.constant 0 : index
      %c0_24 = arith.constant 0 : index
      %35 = vector.load %arg5[%c0_23, %c0_24] : memref<2x4xf32, #tpu.memory_space<vmem>>, vector<2x4xf32>
      tpu.vector_store %arg5[%c0_23, %c0_24], %34 {strides = array<i32>} : memref<2x4xf32, #tpu.memory_space<vmem>>, vector<2x4xf32>,
      %cst_25 = arith.constant 0.000000e+00 : f32
      %36 = vector.broadcast %cst_25 : f32 to vector<2x4xf32>
      %c0_26 = arith.constant 0 : index
      %c0_27 = arith.constant 0 : index
      %37 = vector.load %arg6[%c0_26, %c0_27] : memref<2x4xf32, #tpu.memory_space<vmem>>, vector<2x4xf32>
      tpu.vector_store %arg6[%c0_26, %c0_27], %36 {strides = array<i32>} : memref<2x4xf32, #tpu.memory_space<vmem>>, vector<2x4xf32>,
      %cst_28 = arith.constant 0.000000e+00 : f32
      %38 = vector.broadcast %cst_28 : f32 to vector<2x4xf32>
      %c0_29 = arith.constant 0 : index
      %c0_30 = arith.constant 0 : index
      %39 = vector.load %arg7[%c0_29, %c0_30] : memref<2x4xf32, #tpu.memory_space<vmem>>, vector<2x4xf32>
      tpu.vector_store %arg7[%c0_29, %c0_30], %38 {strides = array<i32>} : memref<2x4xf32, #tpu.memory_space<vmem>>, vector<2x4xf32>,
    } else {
    }
    %c0 = arith.constant 0 : index
    %c0_1 = arith.constant 0 : index
    %c0_2 = arith.constant 0 : index
    %3 = vector.load %arg2[%c0, %c0_1, %c0_2] : memref<2x4x128xf32, #tpu.memory_space<vmem>>, vector<2x4x128xf32>
    %c0_3 = arith.constant 0 : index
    %c0_4 = arith.constant 0 : index
    %4 = vector.load %arg3[%c0_3, %c0_4] : memref<2x128xi32, #tpu.memory_space<vmem>>, vector<2x128xi32>
    %cst = arith.constant 5.000000e-01 : f32
    %5 = vector.broadcast %cst : f32 to vector<2x4x128xf32>
    %6 = arith.cmpf ogt, %3, %5 : vector<2x4x128xf32>
    %7 = tpu.iota {dimensions = array<i32: 1>} : vector<1x4x1xi32>
    %8 = vector.shape_cast %4 : vector<2x128xi32> to vector<2x1x128xi32>
    %9 = vector.broadcast %8 : vector<2x1x128xi32> to vector<2x4x128xi32>
    %10 = vector.broadcast %7 : vector<1x4x1xi32> to vector<2x4x128xi32>
    %11 = arith.cmpi eq, %9, %10 : vector<2x4x128xi32>
    %12 = arith.andi %6, %11 : vector<2x4x128xi1>
    %c0_5 = arith.constant 0 : index
    %c0_6 = arith.constant 0 : index
    %13 = vector.load %arg5[%c0_5, %c0_6] : memref<2x4xf32, #tpu.memory_space<vmem>>, vector<2x4xf32>
    %14 = arith.extui %6 : vector<2x4x128xi1> to vector<2x4x128xi32>
    %15 = arith.sitofp %14 : vector<2x4x128xi32> to vector<2x4x128xf32>
    %cst_7 = arith.constant dense<0.000000e+00> : vector<2x4xf32>
    %16 = vector.multi_reduction <add>, %15, %cst_7 [2] : vector<2x4x128xf32> to vector<2x4xf32>
    %17 = arith.addf %13, %16 : vector<2x4xf32>
    %c0_8 = arith.constant 0 : index
    %c0_9 = arith.constant 0 : index
    %18 = vector.load %arg5[%c0_8, %c0_9] : memref<2x4xf32, #tpu.memory_space<vmem>>, vector<2x4xf32>
    tpu.vector_store %arg5[%c0_8, %c0_9], %17 {strides = array<i32>} : memref<2x4xf32, #tpu.memory_space<vmem>>, vector<2x4xf32>,
    %c0_10 = arith.constant 0 : index
    %c0_11 = arith.constant 0 : index
    %19 = vector.load %arg6[%c0_10, %c0_11] : memref<2x4xf32, #tpu.memory_space<vmem>>, vector<2x4xf32>
    %20 = arith.extui %11 : vector<2x4x128xi1> to vector<2x4x128xi32>
    %21 = arith.sitofp %20 : vector<2x4x128xi32> to vector<2x4x128xf32>
    %cst_12 = arith.constant dense<0.000000e+00> : vector<2x4xf32>
    %22 = vector.multi_reduction <add>, %21, %cst_12 [2] : vector<2x4x128xf32> to vector<2x4xf32>
    %23 = arith.addf %19, %22 : vector<2x4xf32>
    %c0_13 = arith.constant 0 : index
    %c0_14 = arith.constant 0 : index
    %24 = vector.load %arg6[%c0_13, %c0_14] : memref<2x4xf32, #tpu.memory_space<vmem>>, vector<2x4xf32>
    tpu.vector_store %arg6[%c0_13, %c0_14], %23 {strides = array<i32>} : memref<2x4xf32, #tpu.memory_space<vmem>>, vector<2x4xf32>,
    %c0_15 = arith.constant 0 : index
    %c0_16 = arith.constant 0 : index
    %25 = vector.load %arg7[%c0_15, %c0_16] : memref<2x4xf32, #tpu.memory_space<vmem>>, vector<2x4xf32>
    %26 = arith.extui %12 : vector<2x4x128xi1> to vector<2x4x128xi32>
    %27 = arith.sitofp %26 : vector<2x4x128xi32> to vector<2x4x128xf32>
    %cst_17 = arith.constant dense<0.000000e+00> : vector<2x4xf32>
    %28 = vector.multi_reduction <add>, %27, %cst_17 [2] : vector<2x4x128xf32> to vector<2x4xf32>
    %29 = arith.addf %25, %28 : vector<2x4xf32>
    %c0_18 = arith.constant 0 : index
    %c0_19 = arith.constant 0 : index
    %30 = vector.load %arg7[%c0_18, %c0_19] : memref<2x4xf32, #tpu.memory_space<vmem>>, vector<2x4xf32>
    tpu.vector_store %arg7[%c0_18, %c0_19], %29 {strides = array<i32>} : memref<2x4xf32, #tpu.memory_space<vmem>>, vector<2x4xf32>,
    %c0_i32_20 = arith.constant 0 : i32
    %31 = arith.cmpi eq, %arg1, %c0_i32_20 : i32
    %32 = arith.extui %31 : i1 to i32
    %c0_i32_21 = arith.constant 0 : i32
    %33 = arith.cmpi ne, %32, %c0_i32_21 : i32
    scf.if %33 {
      %c0_22 = arith.constant 0 : index
      %c0_23 = arith.constant 0 : index
      %34 = vector.load %arg5[%c0_22, %c0_23] : memref<2x4xf32, #tpu.memory_space<vmem>>, vector<2x4xf32>
      %c0_24 = arith.constant 0 : index
      %c0_25 = arith.constant 0 : index
      %c0_26 = arith.constant 0 : index
      %35 = vector.load %arg4[%c0_24, %c0_25, %c0_26] : memref<3x2x4xf32, #tpu.memory_space<vmem>>, vector<1x2x4xf32>
      %36 = vector.shape_cast %35 : vector<1x2x4xf32> to vector<2x4xf32>
      %37 = vector.shape_cast %34 : vector<2x4xf32> to vector<1x2x4xf32>
      tpu.vector_store %arg4[%c0_24, %c0_25, %c0_26], %37 {strides = array<i32>} : memref<3x2x4xf32, #tpu.memory_space<vmem>>, vector<1x2x4xf32>,
      %c0_27 = arith.constant 0 : index
      %c0_28 = arith.constant 0 : index
      %38 = vector.load %arg6[%c0_27, %c0_28] : memref<2x4xf32, #tpu.memory_space<vmem>>, vector<2x4xf32>
      %c1 = arith.constant 1 : index
      %c0_29 = arith.constant 0 : index
      %c0_30 = arith.constant 0 : index
      %39 = vector.load %arg4[%c1, %c0_29, %c0_30] : memref<3x2x4xf32, #tpu.memory_space<vmem>>, vector<1x2x4xf32>
      %40 = vector.shape_cast %39 : vector<1x2x4xf32> to vector<2x4xf32>
      %41 = vector.shape_cast %38 : vector<2x4xf32> to vector<1x2x4xf32>
      tpu.vector_store %arg4[%c1, %c0_29, %c0_30], %41 {strides = array<i32>} : memref<3x2x4xf32, #tpu.memory_space<vmem>>, vector<1x2x4xf32>,
      %c0_31 = arith.constant 0 : index
      %c0_32 = arith.constant 0 : index
      %42 = vector.load %arg7[%c0_31, %c0_32] : memref<2x4xf32, #tpu.memory_space<vmem>>, vector<2x4xf32>
      %c2 = arith.constant 2 : index
      %c0_33 = arith.constant 0 : index
      %c0_34 = arith.constant 0 : index
      %43 = vector.load %arg4[%c2, %c0_33, %c0_34] : memref<3x2x4xf32, #tpu.memory_space<vmem>>, vector<1x2x4xf32>
      %44 = vector.shape_cast %43 : vector<1x2x4xf32> to vector<2x4xf32>
      %45 = vector.shape_cast %42 : vector<2x4xf32> to vector<1x2x4xf32>
      tpu.vector_store %arg4[%c2, %c0_33, %c0_34], %45 {strides = array<i32>} : memref<3x2x4xf32, #tpu.memory_space<vmem>>, vector<1x2x4xf32>,
    } else {
    }
    return
  }
  func.func @transform_0(%arg0: i32, %arg1: i32) -> (i32, i32, i32) {
    %c1_i32 = arith.constant 1 : i32
    %0 = arith.muli %arg0, %c1_i32 : i32
    %1 = arith.addi %0, %arg1 : i32
    %c0_i32 = arith.constant 0 : i32
    %c0_i32_0 = arith.constant 0 : i32
    %c0_i32_1 = arith.constant 0 : i32
    return %c0_i32, %c0_i32_0, %1 : i32, i32, i32
  }
  func.func @transform_1(%arg0: i32, %arg1: i32) -> (i32, i32) {
    %c1_i32 = arith.constant 1 : i32
    %0 = arith.muli %arg0, %c1_i32 : i32
    %1 = arith.addi %0, %arg1 : i32
    %c0_i32 = arith.constant 0 : i32
    %c0_i32_0 = arith.constant 0 : i32
    return %c0_i32, %1 : i32, i32
  }
  func.func @transform_2(%arg0: i32, %arg1: i32) -> (i32, i32, i32) {
    %c0_i32 = arith.constant 0 : i32
    %c0_i32_0 = arith.constant 0 : i32
    %c0_i32_1 = arith.constant 0 : i32
    return %arg0, %c0_i32, %c0_i32_0 : i32, i32, i32
  }
}

</mosaic_0001>

<bundles_post_ra>
// kernel: tpu_custom_call.1
= control target key start
LH: loop header
LB: loop body
LE: loop exit
PB: predicated region body
PF: predicated region fallthrough
CT: control target
= control target key end

     0   :  { %7 = vsyncpa [#allocation6], 0  ;;  %s839_s0 = inlined_call_operand.hbm [shape: f32[2,4,256], index: 0, kind: input, shape index: {}]   ;;  %s840_s1 = inlined_call_operand.hbm [shape: s32[2,256], index: 1, kind: input, shape index: {}]   ;;  %s841_s2 = inlined_call_operand.vmem [shape: f32[6,2,4], index: 2, kind: output, shape index: {}]  }
   0x1   :  { %9 = vsyncpa [#allocation6 + $0x1], 0 }
   0x2   :  { %10 = vsyncpa [#allocation8], 0 }
   0x3   :  { %12 = vsyncpa [#allocation8 + $0x1], 0  ;;  %s684_s9 = smov 0   ;;  %s686_s10 = smov 0  }
   0x4   :  { %s688_s11 = smov 0   ;;  %s690_s12 = smov 0  }
   0x5   :  { %s692_s13 = smov 0   ;;  %s694_s14 = smov 0  }
   0x6 LB: > { %s462_s15 = sadd.s32 4294967295, %s660_s14   ;;  %s30_s16 = sadd.s32 1, %s656_s13  ;;  %s660_s14 = sphi %s694_s14, %s18_s14   ;;  %s656_s13 = sphi %s692_s13, %s850_s13   ;;  %s652_s12 = sphi %s690_s12, %s849_s12   ;;  %s648_s11 = sphi %s688_s11, %s848_s11   ;;  %s644_s10 = sphi %s686_s10, %s847_s10   ;;  %s640_s9 = sphi %s684_s9, %s846_s9  }
   0x7   : > { %p32_p0 = scmp.ge.s32.totalorder %s30_s16, 2  ;;  %s39_s17 = sadd.s32 1, %s648_s11 }
   0x8   : > { %p46_p1 = scmp.ne.s32.totalorder %s648_s11, %s644_s10  ;;  %p47_p2 = scmp.eq.s32.totalorder %s660_s14, 0 }
   0x9   : > { %s852_s16 = smov (%p32_p0, %s30_s16), 0  ;;  %p52_p4 = scmp.ne.s32.totalorder %s644_s10, %s640_s9 }
   0xa   : > { %p720_p3 = por %p47_p2, %p46_p1  ;;  %s36_s19 = ssub.s32 %s656_s13, %s852_s16 }
   0xb   : > { %p53_p5 = scmp.eq.s32.totalorder %s462_s15, 0  ;;  %p37_p6 = scmp.eq.s32.totalorder %s36_s19, 0 }
   0xc   : > { %p496_p8 = scmp.lt.s32.totalorder %s660_s14, 2  ;;  %s736_s22 = sand.u32 1, %s648_s11  }
   0xd   : > { %p727_p7 = por %p53_p5, %p52_p4  ;;  %s467_s23 = sshll.u32 %s656_s13, 6 }
   0xe   : > { %s733_s21 = scalar_select %p37_p6, %s648_s11, %s39_s17  }
   0xf   : > { %s466_s24 = sshll.u32 %s736_s22, 3  ;;  %s140_s27 = scalar_lea.hbm %s839_s0, %s467_s23 }
  0x10   : > { %s134_s28 = scalar_lea.vmem [#allocation5], %s466_s24  ;;  %p745_p9 = pnand %p496_p8, %p720_p3 }
  0x11   : > { %s141_s29 = sshll.u32 %s134_s28, 4  ;;  %p470_p10 = scmp.ge.s32.totalorder %s660_s14, 1  ;;  %s142_s29 = int_to_ptr.vmem [resolvable:$true] %s141_s29 }
  0x12   : > { %s131_s3 = scalar_lea.sflag [#allocation6], %s736_s22  ;;  %p552_p11 = pneg %p745_p9 }
  0x13   : > { %s563_s4 = scalar_lea.vmem %s142_s29, 128  ;;  %s662_s5 = smov [#allocation5]  }
  0x14   : > { %p564_p12 = scmp.ne.s32.totalorder %s142_s29, %s563_s4  ;;  %s568_s6 = sshll.u32 %s662_s5, 4  ;;  %s569_s6 = int_to_ptr.vmem [resolvable:$false] %s568_s6 }
  0x15   : > { %s570_s7 = scalar_lea.vmem %s569_s6, 256  ;;  %p571_p1 = scmp.lt.s32.totalorder %s142_s29, %s569_s6 }
  0x16   : > { %p566_p13 = pnand %p564_p12, %p552_p11  ;;  %p572_p2 = scmp.lt.s32.totalorder %s570_s7, %s563_s4 }
  0x18   : > { %p567_p0 = pneg %p566_p13  ;;  %p573_p3 = por %p572_p2, %p571_p1 }
  0x1a   : > { %p574_p4 = pnand %p573_p3, %p567_p0 }
  0x1c   : > { %577 = shalt.err (!%p574_p4)
}
  0x1d   : > { %s663_s8 = smov 128   ;;  %s664_s9 = smov 64  }
  0x1e   : > { %s665_s15 = smov 4   ;;  %p168_p5 = scmp.lt.s32.totalorder %s660_s14, 3 }
  0x1f   : > { %492 = dma.hbm_to_vmem [thread:$0]  (!%p745_p9), %s140_s27, 128, %s142_s29, %s131_s3, %s663_s8, %s664_s9, %s665_s15  }
  0x20   : > { %s468_s17 = sshll.u32 %s736_s22, 1  ;;  %s469_s18 = sshll.u32 %s656_s13, 5 }
  0x21   : > { %p763_p6 = pnand %p470_p10, %p168_p5  ;;  %s161_s25 = scalar_lea.hbm %s840_s1, %s469_s18 }
  0x22   : > { %s155_s26 = scalar_lea.vmem [#allocation7], %s468_s17  ;;  %s152_s4 = scalar_lea.sflag [#allocation8], %s736_s22 }
  0x23   : > { %s163_s28 = sshll.u32 %s155_s26, 4  ;;  %s666_s27 = smov [#allocation7]   ;;  %s164_s28 = int_to_ptr.vmem [resolvable:$true] %s163_s28 }
  0x24   : > { %s591_s5 = scalar_lea.vmem %s164_s28, 32  ;;  %s596_s29 = sshll.u32 %s666_s27, 4  ;;  %s597_s29 = int_to_ptr.vmem [resolvable:$false] %s596_s29 }
  0x25   : > { %p592_p8 = scmp.ne.s32.totalorder %s164_s28, %s591_s5  ;;  %s598_s3 = scalar_lea.vmem %s597_s29, 64 }
  0x26   : > { %p599_p10 = scmp.lt.s32.totalorder %s164_s28, %s597_s29  ;;  %p600_p0 = scmp.lt.s32.totalorder %s598_s3, %s591_s5 }
  0x27   : > { %p594_p12 = pnand %p592_p8, %p552_p11 }
  0x28   : > { %p601_p1 = por %p600_p0, %p599_p10 }
  0x29   : > { %p595_p13 = pneg %p594_p12 }
  0x2b   : > { %p602_p2 = pnand %p601_p1, %p595_p13 }
  0x2d   : > { %605 = shalt.err (!%p602_p2)
}
  0x2e   : > { %495 = dma.hbm_to_vmem [thread:$0]  (!%p745_p9), %s161_s25, 32, %s164_s28, %s152_s4  }
  0x2f   : > { %172 = sbr.rel (%p763_p6) target bundleno = 230 (0xe6), region = 28  ;;  %s174_s22 = sand.u32 (!%p763_p6), 1, %s644_s10  }
  0x30   : > { %s471_s6 = sshll.u32 (!%p763_p6), %s174_s22, 3  ;;  %s175_s7 = scalar_lea.sflag (!%p763_p6), [#allocation6], %s174_s22 }
  0x31   : > { %s178_s8 = scalar_lea.vmem (!%p763_p6), [#allocation5], %s471_s6 }
  0x34   : > { %631 = dma.done.wait (%p727_p7), %s175_s7, 128  }
  0x35   : > { %633 = vsyncadd (%p727_p7), %s175_s7, 4294967168  ;;  %s472_s9 = sshll.u32 %s174_s22, 1  ;;  %s184_s15 = scalar_lea.sflag [#allocation8], %s174_s22 }
  0x36   : > { %s187_s17 = scalar_lea.vmem [#allocation7], %s472_s9 }
  0x37   : > { %635 = dma.done.wait (%p727_p7), %s184_s15, 32  }
  0x38   : > { %637 = vsyncadd (%p727_p7), %s184_s15, 4294967264  ;;  %v234_v0 = vlaneseq  ;;  %v667_v1 = vmov 1966171168   ;;  %vm275_vm0 = vcmask 1043456   ;;  %v229_v9 = vld [vmem:[%s178_s8] sm:$0xf] }
  0x39   : > { %v245_v2 = vunpack.c.l.s4 %v667_v1  ;;  %v474_v10 = vld.sshfl [vmem:[%s187_s17] sm:$0x11 pattern:$0x75316420]  ;;  %vm232_vm1 = vcmp.gt.f32.partialorder %v229_v9, 0.5  ;;  %v668_v14 = vmov 0.0  }
  0x3a   : > { %v235_v3 = vshrl.u32 %v234_v0, 7  ;;  %v285_v4 = vand.u32 127, %v234_v0  ;;  %v243_v12 = vcombine.high %v474_v10, %v474_v10  ;;  %v230_v13 = vld [vmem:[%s178_s8 + $0x4] sm:$0xf]  ;;  %v475_v15 = vsel %vm232_vm1, 1.0, %v668_v14  ;;  %s215_s20 = smul.u32 3, %s652_s12 }
  0x3b   : > { %v246_v5 = vunpack.c.0.s8 %v245_v2  ;;  %vm233_vm2 = vcmp.gt.f32.partialorder %v230_v13, 0.5  ;;  %v276_v16 = vsel %vm275_vm0, %v475_v15, 0.0  ;;  %vm225_vm7 = vcmask 25600  }
  0x3c   : > { %v787_v6 = vsub.s32 %v285_v4, %v235_v3  ;;  %v260_v8 = vsub.s32 0, %v235_v3  ;;  %v476_v18 = vsel %vm233_vm2, 1.0, %v668_v14  ;;  %277 = vadd.xlane.f32.xlu0 %v276_v16  ;;  %226 = vst.msk [vmem:[#allocation2] sm:$0x3] %vm225_vm7, %v668_v14  ;;  %227 = vst.msk [vmem:[#allocation3] sm:$0x3] %vm225_vm7, %v668_v14 }
  0x3d   : > { %v249_v7 = vsub.s32 %v246_v5, %v235_v3  ;;  %v279_v20 = vsel %vm275_vm0, %v476_v18, 0.0  ;;  %228 = vst.msk [vmem:[#allocation4] sm:$0x3] %vm225_vm7, %v668_v14  ;;  %p216_p7 = scmp.lt.s32.totalorder %s215_s20, 5  ;;  %vm294_vm8 = vcmask 1041409  }
  0x3f   : > { %v250_v11 = vrot.slane %v474_v10, %v249_v7  ;;  %v257_v19 = vrot.slane %v243_v12, %v249_v7  ;;  %s854_s20 = smov (!%p216_p7, %s215_s20), 5 }
  0x40   : > { %280 = vadd.xlane.f32.xlu0 %v279_v20  ;;  %s473_s12 = sshll.u32 %s854_s20, 1 }
  0x41   : > { %v261_v17 = vrot.slane %v250_v11, %v260_v8  ;;  %v265_v21 = vrot.slane %v257_v19, %v260_v8  ;;  %s219_s19 = scalar_lea.vmem %s841_s2, %s473_s12 }
  0x43   : > { %vm266_vm3 = vcmp.eq.s32.totalorder %v261_v17, %v235_v3  ;;  %vm267_vm5 = vcmp.eq.s32.totalorder %v265_v21, %v235_v3  ;;  %v270_v34 = vld [vmem:[#allocation2] sm:$0x3]  ;;  %v300_v41 = vld [vmem:[#allocation3] sm:$0x3] }
  0x44   : > { %v477_v22 = vsel %vm266_vm3, 1.0, %v668_v14  ;;  %vm268_vm4 = vmand %vm232_vm1, %vm266_vm3  ;;  %v478_v25 = vsel %vm267_vm5, 1.0, %v668_v14  ;;  %v325_v48 = vld [vmem:[#allocation4] sm:$0x3] }
  0x45   : > { %v305_v23 = vsel %vm275_vm0, %v477_v22, 0.0  ;;  %v479_v24 = vsel %vm268_vm4, 1.0, %v668_v14  ;;  %vm269_vm6 = vmand %vm233_vm2, %vm267_vm5  ;;  %v308_v26 = vsel %vm275_vm0, %v478_v25, 0.0 }
  0x46   : > { %306 = vadd.xlane.f32.xlu1 %v305_v23  ;;  %v330_v27 = vsel %vm275_vm0, %v479_v24, 0.0  ;;  %v480_v28 = vsel %vm269_vm6, 1.0, %v668_v14 }
  0x47   : > { %331 = vadd.xlane.f32.xlu0 %v330_v27  ;;  %v333_v29 = vsel %vm275_vm0, %v480_v28, 0.0 }
  0x4a   : > { %309 = vadd.xlane.f32.xlu1 %v308_v26 }
  0x4e   : > { %334 = vadd.xlane.f32.xlu1 %v333_v29 }
  0xc5   : > { %v278_v30 = vpop.xlane.xlu0 %277 }
  0xc6   : > { %v289_v31 = vrot.slane %v278_v30, %v787_v6 }
  0xc9   : > { %v281_v33 = vpop.xlane.xlu0 %280 }
  0xca   : > { %v293_v35 = vrot.slane %v281_v33, %v787_v6 }
  0xcc   : > { %v295_v36 = vsel %vm294_vm8, %v293_v35, %v289_v31 }
  0xcd   : > { %v297_v37 = vadd.f32 %v295_v36, %v270_v34 }
  0xcf   : > { %v307_v32 = vpop.xlane.xlu1 %306  ;;  %299 = vst.msk [vmem:[#allocation2] sm:$0x3] %vm225_vm7, %v297_v37 }
  0xd0   : > { %v332_v39 = vpop.xlane.xlu0 %331  ;;  %v316_v40 = vrot.slane %v307_v32, %v787_v6 }
  0xd1   : > { %v341_v44 = vrot.slane %v332_v39, %v787_v6 }
  0xd3   : > { %v310_v38 = vpop.xlane.xlu1 %309 }
  0xd4   : > { %v320_v42 = vrot.slane %v310_v38, %v787_v6 }
  0xd6   : > { %v321_v43 = vsel %vm294_vm8, %v320_v42, %v316_v40  ;;  %v353_v51 = vld [vmem:[#allocation2] sm:$0x3] }
  0xd7   : > { %v323_v45 = vadd.f32 %v321_v43, %v300_v41  ;;  %v335_v46 = vpop.xlane.xlu1 %334  ;;  %354 = vst.msk [vmem:[%s219_s19] sm:$0x3] %vm225_vm7, %v353_v51 }
  0xd8   : > { %v345_v47 = vrot.slane %v335_v46, %v787_v6 }
  0xd9   : > { %324 = vst.msk [vmem:[#allocation3] sm:$0x3] %vm225_vm7, %v323_v45 }
  0xda   : > { %v346_v49 = vsel %vm294_vm8, %v345_v47, %v341_v44 }
  0xdb   : > { %v348_v50 = vadd.f32 %v346_v49, %v325_v48 }
  0xdd   : > { %349 = vst.msk [vmem:[#allocation4] sm:$0x3] %vm225_vm7, %v348_v50 }
  0xe0   : > { %v355_v52 = vld [vmem:[#allocation3] sm:$0x3] }
  0xe1   : > { %481 = vst.msk [vmem:[%s219_s19 + $0x2] sm:$0x3] %vm225_vm7, %v355_v52 }
  0xe4   : > { %v358_v53 = vld [vmem:[#allocation4] sm:$0x3] }
  0xe5   : > { %482 = vst.msk [vmem:[%s219_s19 + $0x4] sm:$0x3] %vm225_vm7, %v358_v53 }
  0xe6 PF: > { %s18_s14 = sadd.s32 1, %s660_s14   ;;  %s846_s9 = smov %s644_s10 }
  0xe7   : > { %p15_p9 = scmp.ge.s32.totalorder %s18_s14, 4   ;;  %s847_s10 = smov %s648_s11 }
  0xe8   : > { %s848_s11 = smov %s733_s21  ;;  %s849_s12 = smov %s656_s13 }
  0xe9   : > { %s850_s13 = smov %s852_s16  ;;  %17 = sbr.rel (!%p15_p9) target bundleno = 6 (0x6), region = 91 }
  0xee   :  { %383 = vsyncpa [#allocation6], 1 }
  0xef   :  { %385 = vsyncpa [#allocation6 + $0x1], 1 }
  0xf0   :  { %386 = vsyncpa [#allocation8], 1 }
  0xf1   :  { %388 = vsyncpa [#allocation8 + $0x1], 1 }

</bundles_post_ra>
